<compile_context>
chip_gen: v6e
topology: v6e:2x2x1
jax: 0.10.0
libtpu: 0.0.40
codegen_flags: <defaults>
</compile_context>

<pallas_src>
import functools

import numpy as np
import jax
import jax.numpy as jnp
from jax import lax
from jax.experimental import pallas as pl
from jax.experimental.pallas import tpu as pltpu


def _round_up(x: int, m: int) -> int:
    return (x + m - 1) // m * m


def _cdiv(a: int, b: int) -> int:
    return -(-a // b)


def _masked_contrastive_loss_kernel(
    a_ref, bt_ref, idx_row_ref, idx_col_ref,          # inputs
    row_ref, col_ref, pos_ref,                        # outputs (partials)
    *, temperature, margin, dcl, has_index, n_valid, pad_rows, pad_cols, groups):
    i = pl.program_id(0)
    j = pl.program_id(1)

    TM = a_ref.shape[0]
    TN = bt_ref.shape[1]

    # ---- init the per-row-tile resident output accumulators at the first
    #      column tile (they only span the "arbitrary" j axis) ----
    @pl.when(j == 0)
    def _():
        row_ref[...] = jnp.zeros_like(row_ref)
        pos_ref[...] = jnp.zeros_like(pos_ref)

    # ---- MXU: logits tile; operands stay in their (possibly bf16) input dtype,
    #      contraction on B^T's major dim avoids per-tile transposes ----
    logits = lax.dot_general(
        a_ref[...], bt_ref[...],
        dimension_numbers=(((1,), (0,)), ((), ())),
        preferred_element_type=jnp.float32,
    ) * jnp.float32(temperature)                       # (TM, TN) f32

    rows = lax.broadcasted_iota(jnp.int32, (TM, 1), 0) + i * TM   # global row ids
    cols = lax.broadcasted_iota(jnp.int32, (1, TN), 1) + j * TN   # global col ids

    if margin > 0.0:
        # reference: logits[pos_mask] -= margin (before exp / pos extraction)
        logits = jnp.where(rows == cols, logits - jnp.float32(margin), logits)

    # ---- single fused keep mask: negatives (∪ diag when not dcl) ∩ validity ----
    keep = None
    if has_index:
        keep = idx_row_ref[...] != idx_col_ref[...]
        if not dcl:
            keep = jnp.logical_or(keep, rows == cols)
    elif dcl:
        keep = rows != cols
    if pad_rows:
        v = rows < n_valid
        keep = v if keep is None else jnp.logical_and(keep, v)
    if pad_cols:
        v = cols < n_valid
        keep = v if keep is None else jnp.logical_and(keep, v)

    exp_l = jnp.exp(logits)
    if keep is not None:
        exp_l = jnp.where(keep, exp_l, 0.0)

    # ---- deferred reductions: lane/sublane-aligned VPU adds only ----
    # Row partials: (TM, 128) lane-group sums accumulated in the resident block.
    rp = exp_l[:, 0:128]
    for g in range(1, groups):
        rp = rp + exp_l[:, g * 128:(g + 1) * 128]
    row_ref[...] += rp
    # Column partials: (8, TN) sublane sums, distinct output block per (i, j),
    # collapsed (sum over i and the 8 sublanes) outside the kernel in XLA.
    cp = exp_l[0:8, :]
    for k in range(1, TM // 8):
        cp = cp + exp_l[k * 8:(k + 1) * 8, :]
    col_ref[0] = cp

    # ---- positive logits: diagonal of the already-computed logits tile
    #      (consistent with the MXU-accumulated denominator); only executed on
    #      tiles whose row/column ranges overlap the diagonal ----
    diag_here = jnp.logical_and(i * TM < (j + 1) * TN, j * TN < (i + 1) * TM)

    @pl.when(diag_here)
    def _():
        pos = jnp.sum(jnp.where(rows == cols, logits, 0.0), axis=1, keepdims=True)
        pos_ref[...] += pos                            # (TM, 1)


class MaskedContrastiveLoss:
    """JAX / Pallas port of avssl.module.losses.MaskedContrastiveLoss (forward only)."""

    def __init__(self, temperature: float = 0.07, temperature_trainable: bool = False,
                 margin: float = 0.0, dcl: bool = False, a2b: bool = True,
                 b2a: bool = True, tile_m: int = 512, tile_n: int = 256,
                 bf16_matmul: bool = False, b_tile_buffers: int = 2):
        assert a2b or b2a, "Cannot set both `a2b` and `b2a` to False."
        assert tile_m % 8 == 0, "tile_m must be a multiple of 8"
        assert tile_n % 128 == 0, "tile_n must be a multiple of 128"
        assert b_tile_buffers >= 2
        self.temperature_trainable = temperature_trainable
        self.margin = float(margin)
        self.dcl = dcl
        self.a2b = a2b
        self.b2a = b2a
        # Asymmetric tiles: large TM keeps feat_A resident across the whole j
        # loop (halving feat_B re-streaming), TN=256 keeps per-step temporaries
        # small.  Auto-shrunk against the per-generation VMEM budget in __call__.
        self.tile_m = tile_m
        self.tile_n = tile_n
        # Optionally feed the MXU bf16 operands (f32 accumulation) - recommended
        # for throughput on the bf16-native MXU when inputs arrive as f32.
        self.bf16_matmul = bf16_matmul
        # >2 deepens the feat_B pipeline (pl.Buffered) if DMA is exposed (v5e).
        self.b_tile_buffers = b_tile_buffers
        if temperature_trainable:
            # TODO(synk): forward-only port; log-temperature is a plain float,
            # no trainable nn.Parameter / autograd path.
            self.log_temperature = float(np.log(1.0 / temperature))
        else:
            self.temperature = 1.0 / temperature

    def __call__(self, feat_A: jnp.ndarray, feat_B: jnp.ndarray, index=None) -> jnp.ndarray:
        assert feat_A.shape == feat_B.shape, (feat_A.shape, feat_B.shape)
        B, D = feat_A.shape

        if self.temperature_trainable:
            temperature = float(np.exp(self.log_temperature))
        else:
            temperature = float(self.temperature)

        in_dtype = feat_A.dtype
        if self.bf16_matmul and in_dtype == jnp.float32:
            mm_dtype = jnp.bfloat16
        else:
            mm_dtype = in_dtype
        itemsize = jnp.dtype(mm_dtype).itemsize

        # ---- per-generation VMEM budget (v7x has 64 MiB/TC, v5e/v6e 128 MiB) ----
        try:
            vmem_cap = int(pltpu.get_tpu_info().vmem_capacity_bytes)
        except Exception:
            vmem_cap = 64 * 1024 * 1024   # conservative (v7x per-TC) fallback
        budget = int(vmem_cap * 0.7)

        tile_m, tile_n = self.tile_m, self.tile_n
        while True:
            nI = _cdiv(B, tile_m)
            TM = _round_up(_cdiv(B, nI), 8)
            nJ = _cdiv(B, tile_n)
            TN = _round_up(_cdiv(B, nJ), 128)
            est = (2 * TM * D * itemsize                          # A tile (double-buffered)
                   + max(2, self.b_tile_buffers) * D * TN * itemsize   # B^T tile
                   + 6 * TM * TN * 4                              # f32 logits/exp/mask temporaries
                   + 2 * TM * 128 * 4 + 2 * 8 * TN * 4 + 2 * TM * 4    # output blocks
                   + 2 * (TM + TN) * 4)                           # label tiles
            if est <= budget:
                break
            if tile_n > 128:
                tile_n //= 2
            elif tile_m > 8:
                tile_m = max(tile_m // 2, 8)
            else:
                # TODO(synk): for very large D a K-tiling grid axis with an
                # (TM, TN) f32 accumulator would bound VMEM independently of D.
                break

        B_pad_r = nI * TM
        B_pad_c = nJ * TN
        pad_r = B_pad_r - B
        pad_c = B_pad_c - B
        groups = TN // 128

        feat_A_p = feat_A
        feat_B_p = feat_B
        if mm_dtype != in_dtype:
            feat_A_p = feat_A_p.astype(mm_dtype)
            feat_B_p = feat_B_p.astype(mm_dtype)
        if pad_r:
            feat_A_p = jnp.pad(feat_A_p, ((0, pad_r), (0, 0)))
        if pad_c:
            feat_B_p = jnp.pad(feat_B_p, ((0, pad_c), (0, 0)))
        # Pre-transpose feat_B once in XLA so the MXU sees (TM, D) x (D, TN).
        feat_Bt = feat_B_p.T                                      # (D, B_pad_c)

        # O(B) int32 label vectors replace the O(B^2) neg-mask HBM transfer.
        has_index = index is not None
        if has_index:
            assert index.shape[0] == B, (index.shape, feat_A.shape)
            idx = jnp.asarray(index, dtype=jnp.int32).reshape(B)
        else:
            idx = jnp.arange(B, dtype=jnp.int32)
        # Padded label values are irrelevant: padded rows/cols are masked by the
        # validity test inside the kernel.
        idx_row = jnp.pad(idx, (0, pad_r), constant_values=-1).reshape(B_pad_r, 1)
        idx_col = jnp.pad(idx, (0, pad_c), constant_values=-2).reshape(1, B_pad_c)

        kernel = functools.partial(
            _masked_contrastive_loss_kernel,
            temperature=temperature, margin=self.margin, dcl=self.dcl,
            has_index=has_index, n_valid=B,
            pad_rows=pad_r > 0, pad_cols=pad_c > 0, groups=groups)

        b_spec_kwargs = {}
        if self.b_tile_buffers != 2:
            b_spec_kwargs = dict(pipeline_mode=pl.Buffered(self.b_tile_buffers))

        grid_spec = pltpu.PrefetchScalarGridSpec(
            num_scalar_prefetch=0,
            grid=(nI, nJ),
            in_specs=[
                pl.BlockSpec((TM, D), lambda i, j: (i, 0)),       # feat_A row tile
                pl.BlockSpec((D, TN), lambda i, j: (0, j), **b_spec_kwargs),  # feat_B^T col tile
                pl.BlockSpec((TM, 1), lambda i, j: (i, 0)),       # labels (rows)
                pl.BlockSpec((1, TN), lambda i, j: (0, j)),       # labels (cols)
            ],
            out_specs=[
                pl.BlockSpec((TM, 128), lambda i, j: (i, 0)),     # row lane-partials
                pl.BlockSpec((1, 8, TN), lambda i, j: (i, 0, j)),  # col sublane-partials
                pl.BlockSpec((TM, 1), lambda i, j: (i, 0)),       # pos logits
            ],
        )
        vmem_limit = int(min(vmem_cap, max(2 * est, 32 * 1024 * 1024)))

        row_part, col_part, pos_part = pl.pallas_call(
            kernel,
            grid_spec=grid_spec,
            out_shape=(
                jax.ShapeDtypeStruct((B_pad_r, 128), jnp.float32),
                jax.ShapeDtypeStruct((nI, 8, B_pad_c), jnp.float32),
                jax.ShapeDtypeStruct((B_pad_r, 1), jnp.float32),
            ),
            compiler_params=pltpu.CompilerParams(
                # Row-tile axis i only touches per-i output blocks, so it can be
                # megacore-sharded on v7x; the reduction axis j stays sequential.
                dimension_semantics=("parallel", "arbitrary"),
                vmem_limit_bytes=vmem_limit),
        )(feat_A_p, feat_Bt, idx_row, idx_col)

        # ---- O(B) finalization in plain XLA: collapse partials, log, mean ----
        pos = pos_part[:B, 0]
        mean_neg_pos = -jnp.mean(pos)
        loss = jnp.float32(0.0)
        if self.a2b:
            row_sum = jnp.sum(row_part[:B], axis=1)
            loss = loss + mean_neg_pos + jnp.mean(jnp.log(row_sum))
        if self.b2a:
            col_sum = jnp.sum(col_part, axis=(0, 1))[:B]
            loss = loss + mean_neg_pos + jnp.mean(jnp.log(col_sum))
        if self.a2b and self.b2a:
            loss = loss * jnp.float32(0.5)
        return loss


def _reference_loss(feat_A, feat_B, temperature, margin, dcl, a2b, b2a, index=None):
    """Pure-JAX reference mirroring the PyTorch forward."""
    B = feat_A.shape[0]
    pos_mask = jnp.eye(B, dtype=bool)
    if index is not None:
        idx = index.reshape(B, 1)
        neg_mask = idx != idx.T
    else:
        neg_mask = ~pos_mask
    if not dcl:
        neg_mask = neg_mask | pos_mask
    neg_mask_fl = neg_mask.astype(feat_A.dtype)

    logits = feat_A @ feat_B.T * temperature
    if margin > 0.0:
        logits = logits - margin * pos_mask.astype(logits.dtype)
    pos_logits = jnp.diag(logits)
    exp_logits = jnp.exp(logits) * neg_mask_fl
    loss = 0.0
    if a2b:
        loss = loss + jnp.mean(-pos_logits + jnp.log(exp_logits.sum(1)))
    if b2a:
        loss = loss + jnp.mean(-pos_logits + jnp.log(exp_logits.sum(0)))
    if a2b and b2a:
        loss = loss / 2
    return loss


if __name__ == "__main__":
    key = jax.random.PRNGKey(0)

    def _make_feats(k, B, D):
        k_a, k_b = jax.random.split(k)
        fa = jax.random.normal(k_a, (B, D), dtype=jnp.float32)
        fb = jax.random.normal(k_b, (B, D), dtype=jnp.float32)
        fa = fa / jnp.linalg.norm(fa, axis=-1, keepdims=True)
        fb = fb / jnp.linalg.norm(fb, axis=-1, keepdims=True)
        return fa, fb

    k1, k2, k3, k4, k5, k6 = jax.random.split(key, 6)

    # 1) default config, tiny shape (single tile, column padding path)
    fa, fb = _make_feats(k1, 8, 32)
    mod = MaskedContrastiveLoss(temperature=0.07)
    got = jax.block_until_ready(mod(fa, fb))
    ref = jax.block_until_ready(
        _reference_loss(fa, fb, 1.0 / 0.07, 0.0, False, True, True))
    np.testing.assert_allclose(np.asarray(got), np.asarray(ref), rtol=1e-3, atol=1e-3)

    # 2) label index with duplicates + margin + padding (B not a multiple of 8)
    fa, fb = _make_feats(k2, 10, 32)
    index = jnp.array([0, 1, 2, 0, 3, 4, 2, 5, 6, 7], dtype=jnp.int32)
    mod = MaskedContrastiveLoss(temperature=0.1, margin=0.2)
    got = jax.block_until_ready(mod(fa, fb, index))
    ref = jax.block_until_ready(
        _reference_loss(fa, fb, 1.0 / 0.1, 0.2, False, True, True, index=index))
    np.testing.assert_allclose(np.asarray(got), np.asarray(ref), rtol=1e-3, atol=1e-3)

    # 3) DCL + asymmetric tiles (TM=384, TN=256 -> diagonal spans two column tiles)
    fa, fb = _make_feats(k3, 384, 128)
    mod = MaskedContrastiveLoss(temperature=0.07, dcl=True)
    got = jax.block_until_ready(mod(fa, fb))
    ref = jax.block_until_ready(
        _reference_loss(fa, fb, 1.0 / 0.07, 0.0, True, True, True))
    np.testing.assert_allclose(np.asarray(got), np.asarray(ref), rtol=1e-3, atol=1e-3)

    # 4) a2b-only
    fa, fb = _make_feats(k4, 16, 64)
    mod = MaskedContrastiveLoss(temperature=0.07, a2b=True, b2a=False)
    got = jax.block_until_ready(mod(fa, fb))
    ref = jax.block_until_ready(
        _reference_loss(fa, fb, 1.0 / 0.07, 0.0, False, True, False))
    np.testing.assert_allclose(np.asarray(got), np.asarray(ref), rtol=1e-3, atol=1e-3)

    # 5) multi-tile 2x2 grid (exercises the megacore-parallel i axis + padding)
    fa, fb = _make_feats(k5, 200, 64)
    mod = MaskedContrastiveLoss(temperature=0.07, tile_m=128, tile_n=128)
    got = jax.block_until_ready(mod(fa, fb))
    ref = jax.block_until_ready(
        _reference_loss(fa, fb, 1.0 / 0.07, 0.0, False, True, True))
    np.testing.assert_allclose(np.asarray(got), np.asarray(ref), rtol=1e-3, atol=1e-3)

    # 6) bf16 matmul operands (f32 accumulation) - looser tolerance
    fa, fb = _make_feats(k6, 64, 32)
    mod = MaskedContrastiveLoss(temperature=0.07, bf16_matmul=True)
    got = jax.block_until_ready(mod(fa, fb))
    ref = jax.block_until_ready(
        _reference_loss(fa, fb, 1.0 / 0.07, 0.0, False, True, True))
    np.testing.assert_allclose(np.asarray(got), np.asarray(ref), rtol=2e-2, atol=2e-2)

    print("KERNEL_OK")
</pallas_src>

<mosaic_0001>
module attributes {stable_mosaic.version = 11 : i64} {
  func.func @_masked_contrastive_loss_kernel(%arg0: i32, %arg1: i32, %arg2: memref<8x32xf32, #tpu.memory_space<vmem>>, %arg3: memref<32x128xf32, #tpu.memory_space<vmem>>, %arg4: memref<8x1xi32, #tpu.memory_space<vmem>>, %arg5: memref<1x128xi32, #tpu.memory_space<vmem>>, %arg6: memref<8x128xf32, #tpu.memory_space<vmem>>, %arg7: memref<1x8x128xf32, #tpu.memory_space<vmem>>, %arg8: memref<8x1xf32, #tpu.memory_space<vmem>>) attributes {dimension_semantics = [#tpu.dimension_semantics<parallel>, #tpu.dimension_semantics<arbitrary>], iteration_bounds = array<i64: 1, 1>, scalar_prefetch = 0 : i64, scratch_operands = 0 : i64, tpu.core_type = #tpu.core_type<tc>, window_params = [{transform_indices = @transform_0, window_bounds = array<i64: 8, 32>}, {transform_indices = @transform_1, window_bounds = array<i64: 32, 128>}, {transform_indices = @transform_2, window_bounds = array<i64: 8, 1>}, {transform_indices = @transform_3, window_bounds = array<i64: 1, 128>}, {transform_indices = @transform_4, window_bounds = array<i64: 8, 128>}, {transform_indices = @transform_5, window_bounds = array<i64: 1, 8, 128>}, {transform_indices = @transform_6, window_bounds = array<i64: 8, 1>}]} {
    %c0_i32 = arith.constant 0 : i32
    %0 = arith.cmpi eq, %arg1, %c0_i32 : i32
    %1 = arith.extui %0 : i1 to i32
    %c0_i32_0 = arith.constant 0 : i32
    %2 = arith.cmpi ne, %1, %c0_i32_0 : i32
    scf.if %2 {
      %cst_20 = arith.constant 0.000000e+00 : f32
      %40 = vector.broadcast %cst_20 : f32 to vector<8x128xf32>
      %c0_21 = arith.constant 0 : index
      %c0_22 = arith.constant 0 : index
      %41 = vector.load %arg6[%c0_21, %c0_22] : memref<8x128xf32, #tpu.memory_space<vmem>>, vector<8x128xf32>
      tpu.vector_store %arg6[%c0_21, %c0_22], %40 {strides = array<i32>} : memref<8x128xf32, #tpu.memory_space<vmem>>, vector<8x128xf32>,
      %cst_23 = arith.constant 0.000000e+00 : f32
      %42 = vector.broadcast %cst_23 : f32 to vector<8x1xf32>
      %c0_24 = arith.constant 0 : index
      %c0_25 = arith.constant 0 : index
      %43 = vector.load %arg8[%c0_24, %c0_25] : memref<8x1xf32, #tpu.memory_space<vmem>>, vector<8x1xf32>
      tpu.vector_store %arg8[%c0_24, %c0_25], %42 {strides = array<i32>} : memref<8x1xf32, #tpu.memory_space<vmem>>, vector<8x1xf32>,
    } else {
    }
    %c0 = arith.constant 0 : index
    %c0_1 = arith.constant 0 : index
    %3 = vector.load %arg2[%c0, %c0_1] : memref<8x32xf32, #tpu.memory_space<vmem>>, vector<8x32xf32>
    %c0_2 = arith.constant 0 : index
    %c0_3 = arith.constant 0 : index
    %4 = vector.load %arg3[%c0_2, %c0_3] : memref<32x128xf32, #tpu.memory_space<vmem>>, vector<32x128xf32>
    %cst = arith.constant dense<0.000000e+00> : vector<8x128xf32>
    %5 = tpu.matmul %3, %4, %cst {dimension_numbers = #tpu.dot_dimension_numbers<[1], [0], [0], [1], [0, 0, 1, 1], [], []>} : vector<8x32xf32>, vector<32x128xf32>, vector<8x128xf32> -> vector<8x128xf32>
    %cst_4 = arith.constant 14.2857141 : f32
    %6 = vector.broadcast %cst_4 : f32 to vector<8x128xf32>
    %7 = arith.mulf %5, %6 : vector<8x128xf32>
    %8 = tpu.iota {dimensions = array<i32: 0>} : vector<8x1xi32>
    %c8_i32 = arith.constant 8 : i32
    %9 = arith.muli %arg0, %c8_i32 : i32
    %10 = vector.broadcast %9 : i32 to vector<8x1xi32>
    %11 = arith.addi %8, %10 : vector<8x1xi32>
    %12 = tpu.iota {dimensions = array<i32: 1>} : vector<1x128xi32>
    %c128_i32 = arith.constant 128 : i32
    %13 = arith.muli %arg1, %c128_i32 : i32
    %14 = vector.broadcast %13 : i32 to vector<1x128xi32>
    %15 = arith.addi %12, %14 : vector<1x128xi32>
    %c8_i32_5 = arith.constant 8 : i32
    %16 = vector.broadcast %c8_i32_5 : i32 to vector<1x128xi32>
    %17 = arith.cmpi slt, %15, %16 : vector<1x128xi32>
    %18 = math.exp %7 : vector<8x128xf32>
    %cst_6 = arith.constant 0.000000e+00 : f32
    %19 = vector.shape_cast %17 : vector<1x128xi1> to vector<1x128xi1>
    %20 = vector.broadcast %19 : vector<1x128xi1> to vector<8x128xi1>
    %21 = vector.broadcast %cst_6 : f32 to vector<8x128xf32>
    %22 = arith.select %20, %18, %21 : vector<8x128xi1>, vector<8x128xf32>
    %c0_7 = arith.constant 0 : index
    %c0_8 = arith.constant 0 : index
    %23 = vector.load %arg6[%c0_7, %c0_8] : memref<8x128xf32, #tpu.memory_space<vmem>>, vector<8x128xf32>
    %24 = arith.addf %23, %22 : vector<8x128xf32>
    %c0_9 = arith.constant 0 : index
    %c0_10 = arith.constant 0 : index
    %25 = vector.load %arg6[%c0_9, %c0_10] : memref<8x128xf32, #tpu.memory_space<vmem>>, vector<8x128xf32>
    tpu.vector_store %arg6[%c0_9, %c0_10], %24 {strides = array<i32>} : memref<8x128xf32, #tpu.memory_space<vmem>>, vector<8x128xf32>,
    %c0_11 = arith.constant 0 : index
    %c0_12 = arith.constant 0 : index
    %c0_13 = arith.constant 0 : index
    %26 = vector.load %arg7[%c0_11, %c0_12, %c0_13] : memref<1x8x128xf32, #tpu.memory_space<vmem>>, vector<1x8x128xf32>
    %27 = vector.shape_cast %26 : vector<1x8x128xf32> to vector<8x128xf32>
    %28 = vector.shape_cast %22 : vector<8x128xf32> to vector<1x8x128xf32>
    tpu.vector_store %arg7[%c0_11, %c0_12, %c0_13], %28 {strides = array<i32>} : memref<1x8x128xf32, #tpu.memory_space<vmem>>, vector<1x8x128xf32>,
    %c8_i32_14 = arith.constant 8 : i32
    %29 = arith.muli %arg0, %c8_i32_14 : i32
    %c1_i32 = arith.constant 1 : i32
    %30 = arith.addi %arg1, %c1_i32 : i32
    %c128_i32_15 = arith.constant 128 : i32
    %31 = arith.muli %30, %c128_i32_15 : i32
    %32 = arith.cmpi slt, %29, %31 : i32
    %c128_i32_16 = arith.constant 128 : i32
    %33 = arith.muli %arg1, %c128_i32_16 : i32
    %c1_i32_17 = arith.constant 1 : i32
    %34 = arith.addi %arg0, %c1_i32_17 : i32
    %c8_i32_18 = arith.constant 8 : i32
    %35 = arith.muli %34, %c8_i32_18 : i32
    %36 = arith.cmpi slt, %33, %35 : i32
    %37 = arith.andi %32, %36 : i1
    %38 = arith.extui %37 : i1 to i32
    %c0_i32_19 = arith.constant 0 : i32
    %39 = arith.cmpi ne, %38, %c0_i32_19 : i32
    scf.if %39 {
      %40 = vector.broadcast %11 : vector<8x1xi32> to vector<8x128xi32>
      %41 = vector.broadcast %15 : vector<1x128xi32> to vector<8x128xi32>
      %42 = arith.cmpi eq, %40, %41 : vector<8x128xi32>
      %cst_20 = arith.constant 0.000000e+00 : f32
      %43 = vector.broadcast %cst_20 : f32 to vector<8x128xf32>
      %44 = arith.select %42, %7, %43 : vector<8x128xi1>, vector<8x128xf32>
      %cst_21 = arith.constant dense<0.000000e+00> : vector<8xf32>
      %45 = vector.multi_reduction <add>, %44, %cst_21 [1] : vector<8x128xf32> to vector<8xf32>
      %46 = vector.shape_cast %45 : vector<8xf32> to vector<8x1xf32>
      %c0_22 = arith.constant 0 : index
      %c0_23 = arith.constant 0 : index
      %47 = vector.load %arg8[%c0_22, %c0_23] : memref<8x1xf32, #tpu.memory_space<vmem>>, vector<8x1xf32>
      %48 = arith.addf %47, %46 : vector<8x1xf32>
      %c0_24 = arith.constant 0 : index
      %c0_25 = arith.constant 0 : index
      %49 = vector.load %arg8[%c0_24, %c0_25] : memref<8x1xf32, #tpu.memory_space<vmem>>, vector<8x1xf32>
      tpu.vector_store %arg8[%c0_24, %c0_25], %48 {strides = array<i32>} : memref<8x1xf32, #tpu.memory_space<vmem>>, vector<8x1xf32>,
    } else {
    }
    return
  }
  func.func @transform_0(%arg0: i32, %arg1: i32) -> (i32, i32) {
    %c0_i32 = arith.constant 0 : i32
    %c0_i32_0 = arith.constant 0 : i32
    return %arg0, %c0_i32 : i32, i32
  }
  func.func @transform_1(%arg0: i32, %arg1: i32) -> (i32, i32) {
    %c0_i32 = arith.constant 0 : i32
    %c0_i32_0 = arith.constant 0 : i32
    return %c0_i32, %arg1 : i32, i32
  }
  func.func @transform_2(%arg0: i32, %arg1: i32) -> (i32, i32) {
    %c0_i32 = arith.constant 0 : i32
    %c0_i32_0 = arith.constant 0 : i32
    return %arg0, %c0_i32 : i32, i32
  }
  func.func @transform_3(%arg0: i32, %arg1: i32) -> (i32, i32) {
    %c0_i32 = arith.constant 0 : i32
    %c0_i32_0 = arith.constant 0 : i32
    return %c0_i32, %arg1 : i32, i32
  }
  func.func @transform_4(%arg0: i32, %arg1: i32) -> (i32, i32) {
    %c0_i32 = arith.constant 0 : i32
    %c0_i32_0 = arith.constant 0 : i32
    return %arg0, %c0_i32 : i32, i32
  }
  func.func @transform_5(%arg0: i32, %arg1: i32) -> (i32, i32, i32) {
    %c0_i32 = arith.constant 0 : i32
    %c0_i32_0 = arith.constant 0 : i32
    return %arg0, %c0_i32, %arg1 : i32, i32, i32
  }
  func.func @transform_6(%arg0: i32, %arg1: i32) -> (i32, i32) {
    %c0_i32 = arith.constant 0 : i32
    %c0_i32_0 = arith.constant 0 : i32
    return %arg0, %c0_i32 : i32, i32
  }
}

</mosaic_0001>

<bundles_post_ra>
// kernel: tpu_custom_call.1
= control target key start
LH: loop header
LB: loop body
LE: loop exit
PB: predicated region body
PF: predicated region fallthrough
CT: control target
= control target key end

     0   :  { %12 = vsyncpa [#allocation3], 0  ;;  %s351_s0 = inlined_call_operand.vmem [shape: f32[8,32], index: 0, kind: input, shape index: {}]   ;;  %s352_s1 = inlined_call_operand.hbm [shape: f32[32,128], index: 1, kind: input, shape index: {}]   ;;  %s353_s2 = inlined_call_operand.vmem [shape: s32[8,1], index: 2, kind: input, shape index: {}]   ;;  %s354_s3 = inlined_call_operand.vmem [shape: s32[1,128], index: 3, kind: input, shape index: {}]   ;;  %s355_s4 = inlined_call_operand.hbm [shape: f32[8,128], index: 4, kind: output, shape index: {0}]   ;;  %s356_s5 = inlined_call_operand.hbm [shape: f32[1,8,128], index: 5, kind: output, shape index: {1}]   ;;  %s357_s6 = inlined_call_operand.vmem [shape: f32[8,1], index: 6, kind: output, shape index: {2}]  }
   0x1   :  { %13 = vsyncpa [#allocation4], 0 }
   0x2   :  { %14 = vsyncpa [#allocation7], 0  ;;  %s286_s21 = smov [#allocation2]  }
   0x3   :  { %s22_s22 = sshll.u32 %s286_s21, 4  ;;  %s23_s22 = int_to_ptr.vmem [resolvable:$true] %s22_s22 }
   0x4   :  { %s228_s23 = scalar_lea.vmem %s23_s22, 512  ;;  %p233_p1 = scmp.lt.s32.totalorder %s23_s22, %s23_s22 }
   0x5   :  { %p229_p0 = scmp.ne.s32.totalorder %s23_s22, %s228_s23  ;;  %p234_p2 = scmp.lt.s32.totalorder %s228_s23, %s228_s23 }
   0x7   :  { %p235_p3 = por %p234_p2, %p233_p1 }
   0x9   :  { %p236_p4 = pnand %p235_p3, %p229_p0 }
   0xb   :  { %239 = shalt.err (!%p236_p4)
}
   0xc   :  { %s287_s2 = smov 128   ;;  %s288_s3 = smov 8  }
   0xd   :  { %28 = dma.hbm_to_vmem [thread:$0]  %s352_s1, 512, %s23_s22, [#allocation3], %s287_s2, %s287_s2, %s288_s3  }
   0xe   :  { %280 = dma.done.wait [#allocation3], 512  }
   0xf   :  { %281 = vsyncadd [#allocation3], 4294966784  ;;  %v289_v0 = vmov 0.0   ;;  %vm290_vm0 = vmmov 0   ;;  %v47_v1 = vld [vmem:[#allocation2 + $0x18] sm:$0xff]  ;;  %v46_v2 = vld [vmem:[#allocation2 + $0x10] sm:$0xff]  ;;  %v123_v6 = vlaneseq }
  0x10   :  { %200 = vmatprep.subr.mxu0 %v289_v0  ;;  %208 = vmatprep.mubr.msk.f32.mxu0 %vm290_vm0, %v289_v0  ;;  %v45_v3 = vld [vmem:[#allocation2 + $0x8] sm:$0xff]  ;;  %v44_v4 = vld [vmem:[#allocation2] sm:$0xff]  ;;  %vm48_vm1 = vcmask 261120   ;;  %vm41_vm2 = vcmask 7168   ;;  %s292_s30 = smov [#allocation5]  }
  0x11   :  { %201 = vmatpush3.msra.mxu0 %v47_v1  ;;  %v43_v5 = vld [vmem:[%s351_s0] sm:$0xff]  ;;  %42 = vst.msk [vmem:[%s357_s6] sm:$0xff] %vm41_vm2, %v289_v0  ;;  %v124_v7 = vshrl.u32 %v123_v6, 7  ;;  %v129_v8 = vand.u32 127, %v123_v6  ;;  %s291_s0 = smov [#allocation6]   ;;  %s167_s7 = sshll.u32 %s292_s30, 4  ;;  %s168_s7 = int_to_ptr.vmem [resolvable:$true] %s167_s7 }
  0x12   :  { %202 = vmatprep.subr.mxu0 %v289_v0  ;;  %s177_s29 = sshll.u32 %s291_s0, 4  ;;  %s178_s29 = int_to_ptr.vmem [resolvable:$true] %s177_s29 }
  0x13   :  { %203 = vmatpush3.msra.mxu0 %v46_v2  ;;  %vm153_vm3 = vcmp.eq.s32.totalorder %v124_v7, %v129_v8  ;;  %vm133_vm4 = vcmp.lt.s32.totalorder %v129_v8, 8  ;;  %s240_s8 = scalar_lea.vmem %s178_s29, 128  ;;  %p245_p6 = scmp.lt.s32.totalorder %s178_s29, %s178_s29 }
  0x14   :  { %204 = vmatprep.subr.mxu0 %v289_v0  ;;  %p241_p5 = scmp.ne.s32.totalorder %s178_s29, %s240_s8  ;;  %p246_p7 = scmp.lt.s32.totalorder %s240_s8, %s240_s8 }
  0x15   :  { %205 = vmatpush3.msra.mxu0 %v45_v3 }
  0x16   :  { %206 = vmatprep.subr.mxu0 %v289_v0  ;;  %p247_p8 = por %p246_p7, %p245_p6 }
  0x17   :  { %207 = vmatpush3.msra.mxu0 %v44_v4 }
  0x18   :  { %209 = vmatmul.mubr.msk.f32.vlgmr.msra.gmra.mxu0 %vm48_vm1, %v43_v5  ;;  %p248_p9 = pnand %p247_p8, %p241_p5 }
  0xd8   :  { %v118_v9 = vpop.f32.mrf.mxu0 }
  0xd9   :  { %v122_v10 = vmul.f32 14.285714, %v118_v9 }
  0xda   :  { %v210_v11 = vpop.f32.mrf.mxu0 }
  0xdb   :  { %v134_v12 = vmul.f32 1.442695, %v122_v10  ;;  %v154_v13 = vsel %vm153_vm3, %v122_v10, 0.0 }
  0xdc   :  { %155 = vadd.xlane.f32.xlu0 %v154_v13 }
  0xdd   :  { %218 = vpow2.f32 %v134_v12 }
  0xea   :  { %v219_v14 = vpop.eup %218 }
  0xeb   :  { %v138_v15 = vsel %vm133_vm4, %v219_v14, 0.0 }
  0xec   :  { %142 = vst [vmem:[#allocation6] sm:$0xff] %v138_v15 }
  0xed   :  { %251 = shalt.err (!%p248_p9)
}
  0xee   :  { %180 = dma.vmem_to_hbm [thread:$0]  %s178_s29, 128, %s356_s5, [#allocation7]   ;;  %141 = vst [vmem:[#allocation5] sm:$0xff] %v138_v15 }
  0xef   :  { %s260_s11 = scalar_lea.vmem %s168_s7, 128  ;;  %p265_p11 = scmp.lt.s32.totalorder %s168_s7, %s168_s7 }
  0xf0   :  { %p261_p10 = scmp.ne.s32.totalorder %s168_s7, %s260_s11  ;;  %p266_p12 = scmp.lt.s32.totalorder %s260_s11, %s260_s11 }
  0xf2   :  { %p267_p13 = por %p266_p12, %p265_p11 }
  0xf4   :  { %p268_p0 = pnand %p267_p13, %p261_p10 }
  0xf6   :  { %271 = shalt.err (!%p268_p0)
}
  0xf7   :  { %170 = dma.vmem_to_hbm [thread:$0]  %s168_s7, 128, %s355_s4, [#allocation4]   ;;  %v157_v16 = vld [vmem:[%s357_s6] sm:$0xff] }
 0x165   :  { %v156_v17 = vpop.xlane.xlu0 %155 }
 0x166   :  { %v158_v18 = vadd.f32 %v157_v16, %v156_v17 }
 0x168   :  { %160 = vst.msk [vmem:[%s357_s6] sm:$0xff] %vm41_vm2, %v158_v18 }
 0x169   :  { %282 = dma.done.wait [#allocation4], 128  }
 0x16a   :  { %283 = vsyncadd [#allocation4], 4294967168 }
 0x16b   :  { %284 = dma.done.wait [#allocation7], 128  }
 0x16c   :  { %285 = vsyncadd [#allocation7], 4294967168 }
 0x16d   :  { %191 = vsyncpa [#allocation3], 1 }
 0x16e   :  { %192 = vsyncpa [#allocation4], 1 }
 0x16f   :  { %193 = vsyncpa [#allocation7], 1 }

</bundles_post_ra>
